<compile_context>
chip_gen: v7x
topology: tpu7x:2x2x1
jax: 0.10.0
libtpu: 0.0.40
codegen_flags: <defaults>
</compile_context>

<pallas_src>
import functools
import math

import jax
import jax.numpy as jnp
from jax.experimental import pallas as pl
from jax.experimental.pallas import tpu as pltpu

NEG_INF = -1.0e9  # same fill value as the PyTorch reference


def _pick(dim, pref, align):
    """Tile size for `dim`: the full dim if dim <= pref, otherwise the largest
    divisor of dim that is <= pref and a multiple of `align` (keeps blocks
    (8,128)-aligned). Falls back to the full dim when no aligned divisor
    exists (correct; pad inputs upstream for awkward sizes)."""
    if dim <= pref:
        return dim
    best = dim
    t = align
    while t <= pref:
        if dim % t == 0:
            best = t
        t += align
    return best


# ---------------------------------------------------------------------------
# Linear layer: y = x @ w + b   (bf16 MXU operands, f32 accumulation)
# ---------------------------------------------------------------------------
def _linear_kernel(x_ref, w_ref, b_ref, o_ref, acc_ref):
    k = pl.program_id(2)

    @pl.when(k == 0)
    def _():
        acc_ref[...] = jnp.zeros_like(acc_ref)

    acc_ref[...] += jnp.dot(
        x_ref[...].astype(jnp.bfloat16),
        w_ref[...].astype(jnp.bfloat16),
        preferred_element_type=jnp.float32,
    )

    @pl.when(k == pl.num_programs(2) - 1)
    def _():
        o_ref[...] = (acc_ref[...] + b_ref[...].astype(jnp.float32)).astype(o_ref.dtype)


def linear(x, w, b, out_dtype=jnp.float32):
    """x: (M, K), w: (K, N) (any float dtype; cast to bf16 in-kernel), b: (N,)."""
    M, K = x.shape
    _, N = w.shape
    tm = _pick(M, 256, 8)
    tn = _pick(N, 256, 128)
    tk = _pick(K, 512, 128)
    b2 = b.reshape(1, N)

    return pl.pallas_call(
        _linear_kernel,
        out_shape=jax.ShapeDtypeStruct((M, N), out_dtype),
        grid_spec=pltpu.PrefetchScalarGridSpec(
            num_scalar_prefetch=0,
            grid=(M // tm, N // tn, K // tk),
            in_specs=[
                pl.BlockSpec((tm, tk), lambda i, j, k: (i, k)),
                pl.BlockSpec((tk, tn), lambda i, j, k: (k, j)),
                pl.BlockSpec((1, tn), lambda i, j, k: (0, j)),
            ],
            out_specs=pl.BlockSpec((tm, tn), lambda i, j, k: (i, j)),
            scratch_shapes=[pltpu.VMEM((tm, tn), jnp.float32)],
        ),
        compiler_params=pltpu.CompilerParams(
            dimension_semantics=("parallel", "parallel", "arbitrary"),
        ),
    )(x, w, b2)


# ---------------------------------------------------------------------------
# Fused multi-head attention core (flash-style online softmax)
#   * q is pre-scaled by 1/sqrt(d_k) (folded into w_q by the wrapper)
#   * bias is a (B, S, S) additive 0/-1e9 mask, shared across heads
# ---------------------------------------------------------------------------
def _mha_kernel(q_ref, k_ref, v_ref, bias_ref, o_ref, m_sc, l_sc, acc_sc):
    kv = pl.program_id(2)

    @pl.when(kv == 0)
    def _():
        m_sc[...] = jnp.full_like(m_sc, -jnp.inf)
        l_sc[...] = jnp.zeros_like(l_sc)
        acc_sc[...] = jnp.zeros_like(acc_sc)

    # Scores: contract last dim of q against last dim of k (transposed-RHS form,
    # no materialized K transpose). bf16 operands, f32 result.
    s = jax.lax.dot_general(
        q_ref[...], k_ref[...],
        dimension_numbers=(((1,), (1,)), ((), ())),
        preferred_element_type=jnp.float32,
    )                                                   # (tq, tkv) f32
    s = s + bias_ref[...].astype(jnp.float32)           # additive 0 / -1e9 mask

    m_prev = m_sc[...]                                   # (tq, 1)
    m_new = jnp.maximum(m_prev, s.max(axis=-1, keepdims=True))
    alpha = jnp.exp(m_prev - m_new)
    p = jnp.exp(s - m_new)                               # (tq, tkv)

    l_sc[...] = alpha * l_sc[...] + p.sum(axis=-1, keepdims=True)
    acc_sc[...] = alpha * acc_sc[...] + jnp.dot(
        p.astype(jnp.bfloat16), v_ref[...], preferred_element_type=jnp.float32
    )
    m_sc[...] = m_new

    @pl.when(kv == pl.num_programs(2) - 1)
    def _():
        inv_l = pl.reciprocal(l_sc[...], approx=True)    # EUP slot, ~free
        o_ref[...] = (acc_sc[...] * inv_l).astype(o_ref.dtype)


def mha(qh, kh, vh, bias, heads):
    """qh/kh/vh: (B*H, S, d_k) bf16 (q pre-scaled); bias: (B, S, S) bf16."""
    BH, S, d_k = qh.shape
    tq = _pick(S, 256, 8)
    tkv = _pick(S, 256, 128)
    # TODO(synk): when d_k < 128, pack several heads per block so the output
    # last dim is lane-dense (avoids masked partial stores / idle MXU columns).

    return pl.pallas_call(
        _mha_kernel,
        out_shape=jax.ShapeDtypeStruct((BH, S, d_k), jnp.float32),
        grid_spec=pltpu.PrefetchScalarGridSpec(
            num_scalar_prefetch=0,
            grid=(BH, S // tq, S // tkv),
            in_specs=[
                pl.BlockSpec((None, tq, d_k), lambda b, qi, ki: (b, qi, 0)),
                pl.BlockSpec((None, tkv, d_k), lambda b, qi, ki: (b, ki, 0)),
                pl.BlockSpec((None, tkv, d_k), lambda b, qi, ki: (b, ki, 0)),
                # mask bias is shared across heads: index batch = bh // heads
                pl.BlockSpec((None, tq, tkv), lambda b, qi, ki: (b // heads, qi, ki)),
            ],
            out_specs=pl.BlockSpec((None, tq, d_k), lambda b, qi, ki: (b, qi, 0)),
            scratch_shapes=[
                pltpu.VMEM((tq, 1), jnp.float32),    # running max
                pltpu.VMEM((tq, 1), jnp.float32),    # running denom
                pltpu.VMEM((tq, d_k), jnp.float32),  # running output
            ],
        ),
        compiler_params=pltpu.CompilerParams(
            dimension_semantics=("parallel", "parallel", "arbitrary"),
        ),
    )(qh, kh, vh, bias)


# ---------------------------------------------------------------------------
# Full SelfAttentionBlock forward
# ---------------------------------------------------------------------------
def self_attention_block(q, k, v, mask, params, heads):
    """q/k/v: (B, S, d_model) f32; mask: broadcastable to (B, heads, S, S)."""
    B, S, d_model = q.shape
    d_k = d_model // heads
    scale = 1.0 / math.sqrt(d_k)

    # Fold the 1/sqrt(d_k) score scale into the query projection (zero cost).
    wq = params["wq"] * scale
    bq = params["bq"] * scale

    if q is k and k is v:
        # Fused QKV projection: activations read once, one kernel launch,
        # wider N tile for the MXU.
        w_qkv = jnp.concatenate([wq, params["wk"], params["wv"]], axis=1)
        b_qkv = jnp.concatenate([bq, params["bk"], params["bv"]])
        qkv = linear(q.reshape(B * S, d_model),
                     w_qkv.astype(jnp.bfloat16), b_qkv,
                     out_dtype=jnp.bfloat16)            # (B*S, 3*d_model)
        Q = qkv[:, :d_model]
        K = qkv[:, d_model:2 * d_model]
        V = qkv[:, 2 * d_model:]
    else:  # cross-attention: separate projections
        Q = linear(q.reshape(B * S, d_model), wq.astype(jnp.bfloat16), bq,
                   out_dtype=jnp.bfloat16)
        K = linear(k.reshape(B * S, d_model), params["wk"].astype(jnp.bfloat16),
                   params["bk"], out_dtype=jnp.bfloat16)
        V = linear(v.reshape(B * S, d_model), params["wv"].astype(jnp.bfloat16),
                   params["bv"], out_dtype=jnp.bfloat16)

    def split_heads(x):
        # TODO(synk): HBM round-trip; removable with a head-indexed BlockSpec
        # once d_k is lane-aligned (>= 128).
        return (
            x.reshape(B, S, heads, d_k)
            .transpose(0, 2, 1, 3)
            .reshape(B * heads, S, d_k)
        )

    qh, kh, vh = split_heads(Q), split_heads(K), split_heads(V)

    # (B, S, S) additive mask bias shared by all heads (no B*H replication).
    # TODO(synk): assumes the mask is head-invariant (standard for this module).
    mask_b = jnp.broadcast_to(mask, (B, heads, S, S))[:, 0]
    bias = jnp.where(mask_b != 0, 0.0, NEG_INF).astype(jnp.bfloat16)

    ctx = mha(qh, kh, vh, bias, heads)                   # (B*H, S, d_k) f32
    ctx = (
        ctx.reshape(B, heads, S, d_k)
        .transpose(0, 2, 1, 3)
        .reshape(B * S, d_model)
    )
    out = linear(ctx, params["wo"].astype(jnp.bfloat16), params["bo"])
    return out.reshape(B, S, d_model)


# ---------------------------------------------------------------------------
# Reference (plain JAX, f32) and demo
# ---------------------------------------------------------------------------
def reference_block(q, k, v, mask, params, heads):
    B, S, d_model = q.shape
    d_k = d_model // heads

    def lin(x, w, b):
        return x @ w + b

    Q = lin(q, params["wq"], params["bq"])
    K = lin(k, params["wk"], params["bk"])
    V = lin(v, params["wv"], params["bv"])

    def split(x):
        return x.reshape(B, S, heads, d_k).transpose(0, 2, 1, 3)

    Qh, Kh, Vh = split(Q), split(K), split(V)
    scores = jnp.einsum("bhqd,bhkd->bhqk", Qh, Kh) / math.sqrt(d_k)
    scores = jnp.where(
        jnp.broadcast_to(mask, (B, heads, S, S)) != 0, scores, NEG_INF
    )
    attn = jax.nn.softmax(scores, axis=-1)
    out = jnp.einsum("bhqk,bhkd->bhqd", attn, Vh)
    out = out.transpose(0, 2, 1, 3).reshape(B, S, d_model)
    return lin(out, params["wo"], params["bo"])


if __name__ == "__main__":
    B, S, d_model, heads = 2, 8, 32, 4

    key = jax.random.PRNGKey(0)
    ks = jax.random.split(key, 12)
    sc = 1.0 / math.sqrt(d_model)
    params = {
        "wq": jax.random.normal(ks[0], (d_model, d_model), jnp.float32) * sc,
        "bq": jax.random.normal(ks[1], (d_model,), jnp.float32) * 0.1,
        "wk": jax.random.normal(ks[2], (d_model, d_model), jnp.float32) * sc,
        "bk": jax.random.normal(ks[3], (d_model,), jnp.float32) * 0.1,
        "wv": jax.random.normal(ks[4], (d_model, d_model), jnp.float32) * sc,
        "bv": jax.random.normal(ks[5], (d_model,), jnp.float32) * 0.1,
        "wo": jax.random.normal(ks[6], (d_model, d_model), jnp.float32) * sc,
        "bo": jax.random.normal(ks[7], (d_model,), jnp.float32) * 0.1,
    }
    x = jax.random.normal(ks[8], (B, S, d_model), jnp.float32)
    # causal mask, broadcastable to (B, heads, S, S); nonzero = attend
    mask = jnp.tril(jnp.ones((S, S), jnp.float32))[None, None, :, :]

    out = self_attention_block(x, x, x, mask, params, heads)
    out = jax.block_until_ready(out)

    ref = reference_block(x, x, x, mask, params, heads)
    assert out.shape == (B, S, d_model)
    # bf16 MXU operands -> small deviations vs the f32 reference are expected.
    assert jnp.allclose(out, ref, atol=3e-2, rtol=3e-2), "mismatch vs reference"

    print("KERNEL_OK")
</pallas_src>

<mosaic_0001>
module attributes {stable_mosaic.version = 11 : i64} {
  func.func @_linear_kernel(%arg0: i32, %arg1: i32, %arg2: i32, %arg3: memref<16x32xf32, #tpu.memory_space<vmem>>, %arg4: memref<32x96xbf16, #tpu.memory_space<vmem>>, %arg5: memref<1x96xf32, #tpu.memory_space<vmem>>, %arg6: memref<16x96xbf16, #tpu.memory_space<vmem>>, %arg7: memref<16x96xf32, #tpu.memory_space<vmem>>) attributes {dimension_semantics = [#tpu.dimension_semantics<parallel>, #tpu.dimension_semantics<parallel>, #tpu.dimension_semantics<arbitrary>], iteration_bounds = array<i64: 1, 1, 1>, scalar_prefetch = 0 : i64, scratch_operands = 1 : i64, tpu.core_type = #tpu.core_type<tc>, window_params = [{transform_indices = @transform_0, window_bounds = array<i64: 16, 32>}, {transform_indices = @transform_1, window_bounds = array<i64: 32, 96>}, {transform_indices = @transform_2, window_bounds = array<i64: 1, 96>}, {transform_indices = @transform_3, window_bounds = array<i64: 16, 96>}]} {
    %c0_i32 = arith.constant 0 : i32
    %0 = arith.cmpi eq, %arg2, %c0_i32 : i32
    %1 = arith.extui %0 : i1 to i32
    %c0_i32_0 = arith.constant 0 : i32
    %2 = arith.cmpi ne, %1, %c0_i32_0 : i32
    scf.if %2 {
      %cst_10 = arith.constant 0.000000e+00 : f32
      %13 = vector.broadcast %cst_10 : f32 to vector<16x96xf32>
      %c0_11 = arith.constant 0 : index
      %c0_12 = arith.constant 0 : index
      %14 = vector.load %arg7[%c0_11, %c0_12] : memref<16x96xf32, #tpu.memory_space<vmem>>, vector<16x96xf32>
      tpu.vector_store %arg7[%c0_11, %c0_12], %13 {strides = array<i32>} : memref<16x96xf32, #tpu.memory_space<vmem>>, vector<16x96xf32>,
    } else {
    }
    %c0 = arith.constant 0 : index
    %c0_1 = arith.constant 0 : index
    %3 = vector.load %arg7[%c0, %c0_1] : memref<16x96xf32, #tpu.memory_space<vmem>>, vector<16x96xf32>
    %c0_2 = arith.constant 0 : index
    %c0_3 = arith.constant 0 : index
    %4 = vector.load %arg3[%c0_2, %c0_3] : memref<16x32xf32, #tpu.memory_space<vmem>>, vector<16x32xf32>
    %5 = arith.truncf %4 : vector<16x32xf32> to vector<16x32xbf16>
    %c0_4 = arith.constant 0 : index
    %c0_5 = arith.constant 0 : index
    %6 = vector.load %arg4[%c0_4, %c0_5] : memref<32x96xbf16, #tpu.memory_space<vmem>>, vector<32x96xbf16>
    %cst = arith.constant dense<0.000000e+00> : vector<16x96xf32>
    %7 = tpu.matmul %5, %6, %cst {dimension_numbers = #tpu.dot_dimension_numbers<[1], [0], [0], [1], [0, 0, 1, 1], [], []>} : vector<16x32xbf16>, vector<32x96xbf16>, vector<16x96xf32> -> vector<16x96xf32>
    %8 = arith.addf %3, %7 : vector<16x96xf32>
    %c0_6 = arith.constant 0 : index
    %c0_7 = arith.constant 0 : index
    %9 = vector.load %arg7[%c0_6, %c0_7] : memref<16x96xf32, #tpu.memory_space<vmem>>, vector<16x96xf32>
    tpu.vector_store %arg7[%c0_6, %c0_7], %8 {strides = array<i32>} : memref<16x96xf32, #tpu.memory_space<vmem>>, vector<16x96xf32>,
    %c0_i32_8 = arith.constant 0 : i32
    %10 = arith.cmpi eq, %arg2, %c0_i32_8 : i32
    %11 = arith.extui %10 : i1 to i32
    %c0_i32_9 = arith.constant 0 : i32
    %12 = arith.cmpi ne, %11, %c0_i32_9 : i32
    scf.if %12 {
      %c0_10 = arith.constant 0 : index
      %c0_11 = arith.constant 0 : index
      %13 = vector.load %arg7[%c0_10, %c0_11] : memref<16x96xf32, #tpu.memory_space<vmem>>, vector<16x96xf32>
      %c0_12 = arith.constant 0 : index
      %c0_13 = arith.constant 0 : index
      %14 = vector.load %arg5[%c0_12, %c0_13] : memref<1x96xf32, #tpu.memory_space<vmem>>, vector<1x96xf32>
      %15 = vector.broadcast %14 : vector<1x96xf32> to vector<16x96xf32>
      %16 = arith.addf %13, %15 : vector<16x96xf32>
      %17 = arith.truncf %16 : vector<16x96xf32> to vector<16x96xbf16>
      %c0_14 = arith.constant 0 : index
      %c0_15 = arith.constant 0 : index
      %18 = vector.load %arg6[%c0_14, %c0_15] : memref<16x96xbf16, #tpu.memory_space<vmem>>, vector<16x96xbf16>
      tpu.vector_store %arg6[%c0_14, %c0_15], %17 {strides = array<i32>} : memref<16x96xbf16, #tpu.memory_space<vmem>>, vector<16x96xbf16>,
    } else {
    }
    return
  }
  func.func @transform_0(%arg0: i32, %arg1: i32, %arg2: i32) -> (i32, i32) {
    %c0_i32 = arith.constant 0 : i32
    return %arg0, %arg2 : i32, i32
  }
  func.func @transform_1(%arg0: i32, %arg1: i32, %arg2: i32) -> (i32, i32) {
    %c0_i32 = arith.constant 0 : i32
    return %arg2, %arg1 : i32, i32
  }
  func.func @transform_2(%arg0: i32, %arg1: i32, %arg2: i32) -> (i32, i32) {
    %c0_i32 = arith.constant 0 : i32
    %c0_i32_0 = arith.constant 0 : i32
    return %c0_i32, %arg1 : i32, i32
  }
  func.func @transform_3(%arg0: i32, %arg1: i32, %arg2: i32) -> (i32, i32) {
    %c0_i32 = arith.constant 0 : i32
    return %arg0, %arg1 : i32, i32
  }
}

</mosaic_0001>

<bundles_post_ra>
// kernel: tpu_custom_call.1
= control target key start
LH: loop header
LB: loop body
LE: loop exit
PB: predicated region body
PF: predicated region fallthrough
CT: control target
= control target key end

     0   :  { %8 = vsyncpa [#allocation4], 0  ;;  %s345_s0 = inlined_call_operand.hbm [shape: f32[16,32], index: 0, kind: input, shape index: {}]   ;;  %s346_s1 = inlined_call_operand.hbm [shape: bf16[32,96], index: 1, kind: input, shape index: {}]   ;;  %s347_s2 = inlined_call_operand.vmem [shape: f32[1,96], index: 2, kind: input, shape index: {}]   ;;  %s348_s3 = inlined_call_operand.hbm [shape: bf16[16,96], index: 3, kind: output, shape index: {}]  }
   0x1   :  { %9 = vsyncpa [#allocation7], 0 }
   0x2   :  { %10 = vsyncpa [#allocation5], 0  ;;  %s267_s12 = smov [#allocation3]   ;;  %s195_s16 = scalar_lea.hbm %s345_s0, 256 }
   0x3   :  { %s16_s13 = sshll.u32 %s267_s12, 4  ;;  %p196_p0 = scmp.ne.s32.totalorder %s345_s0, %s195_s16  ;;  %s17_s13 = int_to_ptr.vmem [resolvable:$true] %s16_s13 }
   0x4   :  { %p199_p1 = scmp.lt.u32.totalorder %s195_s16, %s345_s0 }
   0x6   :  { %p201_p2 = pnand %p199_p1, %p196_p0 }
   0x8   :  { %204 = shalt.err (!%p201_p2)
}
   0x9   :  { %s205_s21 = scalar_lea.vmem %s17_s13, 256  ;;  %p210_p4 = scmp.lt.s32.totalorder %s17_s13, %s17_s13 }
   0xa   :  { %p206_p3 = scmp.ne.s32.totalorder %s17_s13, %s205_s21  ;;  %p211_p5 = scmp.lt.s32.totalorder %s205_s21, %s205_s21 }
   0xc   :  { %p212_p6 = por %p211_p5, %p210_p4 }
   0xe   :  { %p213_p7 = pnand %p212_p6, %p206_p3 }
  0x10   :  { %216 = shalt.err (!%p213_p7)
}
  0x11   :  { %s268_s22 = smov 128   ;;  %s269_s23 = smov 8  }
  0x12   :  { %22 = dma.hbm_to_vmem [thread:$0]  %s345_s0, 256, %s17_s13, [#allocation4], %s268_s22, %s268_s22, %s269_s23  }
  0x13   :  { %s270_s26 = smov [#allocation6]   ;;  %s217_s30 = scalar_lea.hbm %s346_s1, 256 }
  0x14   :  { %s28_s27 = sshll.u32 %s270_s26, 4  ;;  %p218_p8 = scmp.ne.s32.totalorder %s346_s1, %s217_s30  ;;  %s29_s27 = int_to_ptr.vmem [resolvable:$true] %s28_s27 }
  0x15   :  { %p221_p9 = scmp.lt.u32.totalorder %s217_s30, %s346_s1 }
  0x17   :  { %p223_p10 = pnand %p221_p9, %p218_p8 }
  0x19   :  { %226 = shalt.err (!%p223_p10)
}
  0x1a   :  { %s227_s8 = scalar_lea.vmem %s29_s27, 256  ;;  %p232_p12 = scmp.lt.s32.totalorder %s29_s27, %s29_s27 }
  0x1b   :  { %p228_p11 = scmp.ne.s32.totalorder %s29_s27, %s227_s8  ;;  %p233_p13 = scmp.lt.s32.totalorder %s227_s8, %s227_s8 }
  0x1d   :  { %p234_p0 = por %p233_p13, %p232_p12 }
  0x1f   :  { %p235_p1 = pnand %p234_p0, %p228_p11 }
  0x21   :  { %238 = shalt.err (!%p235_p1)
}
  0x22   :  { %s271_s0 = smov 64   ;;  %s272_s9 = smov 4  }
  0x23   :  { %34 = dma.hbm_to_vmem [thread:$0]  %s346_s1, 256, %s29_s27, [#allocation7], %s271_s0, %s271_s0, %s272_s9  }
  0x24   :  { %261 = dma.done.wait [#allocation4], 256  }
  0x25   :  { %262 = vsyncadd [#allocation4], 4294967040 }
  0x26   :  { %263 = dma.done.wait [#allocation7], 256  }
  0x27   :  { %264 = vsyncadd [#allocation7], 4294967040  ;;  %vm48_vm0 = vcmask 785408   ;;  %v273_v0 = vmov 0.0   ;;  %vm274_vm1 = vmmov 0   ;;  %v193_v1 = vld [vmem:[#allocation6] sm:$0xff]  }
  0x28   :  { %49 = vst.msk [vmem:[#allocation2] sm:$0xff] %vm48_vm0, %v273_v0  ;;  %50 = vst.msk [vmem:[#allocation2 + $0x8] sm:$0xff] %vm48_vm0, %v273_v0  ;;  %176 = vmatprep.subr.bf16.mxu0 %v273_v0  ;;  %180 = vmatprep.mubr.msk.bf16.mxu0 %vm274_vm1, %v273_v0  ;;  %v194_v2 = vld [vmem:[#allocation6 + $0x8] sm:$0xff]   ;;  %v53_v3 = vld [vmem:[#allocation3] sm:$0xff]  ;;  %vm72_vm2 = vcmask 261120   ;;  %vm144_vm3 = vcmask 781312  }
  0x29   :  { %177 = vmatpush3.bf16.msra.mxu0 %v193_v1  ;;  %v54_v4 = vld [vmem:[#allocation3 + $0x8] sm:$0xff]  ;;  %v168_v14 = vld [vmem:[%s347_s2] ss:$0 sm:$0xff]  ;;  %s275_s13 = smov [#allocation8]  }
  0x2a   :  { %178 = vmatprep.subr.bf16.mxu0 %v273_v0  ;;  %v55_v5 = vpack.c.bf16 %v54_v4, %v53_v3  ;;  %s152_s14 = sshll.u32 %s275_s13, 4  ;;  %s153_s14 = int_to_ptr.vmem [resolvable:$true] %s152_s14 }
  0x2b   :  { %s239_s15 = scalar_lea.vmem %s153_s14, 128  ;;  %p244_p3 = scmp.lt.s32.totalorder %s153_s14, %s153_s14 }
  0x2c   :  { %p240_p2 = scmp.ne.s32.totalorder %s153_s14, %s239_s15  ;;  %p245_p4 = scmp.lt.s32.totalorder %s239_s15, %s239_s15 }
  0x2d   :  { %179 = vmatpush3.bf16.msra.mxu0 %v194_v2 }
  0x2e   :  { %p246_p5 = por %p245_p4, %p244_p3 }
  0x2f   :  { %v51_v6 = vld [vmem:[#allocation2] sm:$0xff]  ;;  %v52_v8 = vld [vmem:[#allocation2 + $0x8] sm:$0xff] }
  0x30   :  { %181 = vmatmul.mubr.msk.bf16.vlgmr.msra.gmra.mrb[0].mxu0 %vm72_vm2, %v55_v5  ;;  %p247_p6 = pnand %p246_p5, %p240_p2 }
 0x103   :  { %v110_v7 = vpop.f32.mrb[0].mxu0 }
 0x104   :  { %v117_v9 = vadd.f32 %v110_v7, %v51_v6  ;;  %v182_v10 = vpop.f32.mrb[1].mxu0 }
 0x105   :  { %v113_v11 = vpop.f32.mrb[2].mxu0 }
 0x106   :  { %120 = vst.msk [vmem:[#allocation2] sm:$0xff] %vm48_vm0, %v117_v9  ;;  %v118_v12 = vadd.f32 %v113_v11, %v52_v8  ;;  %v183_v13 = vpop.f32.mrb[3].mxu0 }
 0x108   :  { %121 = vst.msk [vmem:[#allocation2 + $0x8] sm:$0xff] %vm48_vm0, %v118_v12 }
 0x10d   :  { %v125_v15 = vld [vmem:[#allocation2] sm:$0xff] }
 0x10e   :  { %v134_v16 = vadd.f32 %v168_v14, %v125_v15 }
 0x10f   :  { %v126_v17 = vld [vmem:[#allocation2 + $0x8] sm:$0xff] }
 0x110   :  { %v135_v18 = vadd.f32 %v168_v14, %v126_v17  ;;  %v171_v19 = vpack.c.bf16 %v134_v16, %v134_v16 }
 0x112   :  { %v172_v20 = vpack.c.bf16 %v135_v18, %v135_v18  ;;  %145 = vst.msk [vmem:[#allocation8] sm:$0xf] %vm144_vm3, %v171_v19 }
 0x114   :  { %146 = vst.msk [vmem:[#allocation8 + $0x4] sm:$0xf] %vm144_vm3, %v172_v20 }
 0x115   :  { %250 = shalt.err (!%p247_p6)
}
 0x116   :  { %s251_s17 = scalar_lea.hbm %s348_s3, 128 }
 0x117   :  { %p252_p7 = scmp.ne.s32.totalorder %s348_s3, %s251_s17  ;;  %p255_p8 = scmp.lt.u32.totalorder %s251_s17, %s348_s3 }
 0x119   :  { %p257_p9 = pnand %p255_p8, %p252_p7 }
 0x11b   :  { %260 = shalt.err (!%p257_p9)
}
 0x11c   :  { %158 = dma.vmem_to_hbm [thread:$0]  %s153_s14, 128, %s348_s3, [#allocation5], %s271_s0, %s271_s0, %s272_s9  }
 0x11d   :  { %265 = dma.done.wait [#allocation5], 128  }
 0x11e   :  { %266 = vsyncadd [#allocation5], 4294967168 }
 0x11f   :  { %162 = vsyncpa [#allocation4], 1 }
 0x120   :  { %163 = vsyncpa [#allocation7], 1 }
 0x121   :  { %164 = vsyncpa [#allocation5], 1 }

</bundles_post_ra>
